<compile_context>
chip_gen: v7x
topology: tpu7x:2x2x1
jax: 0.10.0
libtpu: 0.0.40
codegen_flags: <defaults>
</compile_context>

<pallas_src>
import functools

import jax
import jax.numpy as jnp
from jax import lax
from jax.experimental import pallas as pl
from jax.experimental.pallas import tpu as pltpu


# ----------------------------- tiling helpers --------------------------------
def _vmem_estimate(tile_l, pad, c_in, c_out, k, itemsize):
    """Rough VMEM footprint (bytes) for one grid step (with double buffering)."""
    io = 2 * tile_l * (c_in + c_out) * itemsize                  # x / out tiles, 2x buffered
    carry = max(pad, 1) * (c_in + 2 * c_out) * 4                 # persistent carries
    weights = 2 * 4 * (k * c_in * c_out + 2 * k * c_out * c_out  # stacked conv weights
                       + c_in * c_out + 4 * c_out)               # residual + biases
    live = 8 * 4 * (tile_l + pad) * max(c_in, c_out, 1)          # in-flight f32 values
    return io + carry + weights + live


def _choose_tile_l(l, pad, c_in, c_out, k, itemsize, budget_bytes=40 << 20):
    """Largest L tile that divides L, is a multiple of 8, covers the causal
    context (>= pad) and fits the VMEM budget (safe on v7x's 64 MiB)."""
    best = None
    for t in range(8, min(l, 2048) + 1, 8):
        if (l % t == 0 and t >= pad
                and _vmem_estimate(t, pad, c_in, c_out, k, itemsize) <= budget_bytes):
            best = t
    if best is None:
        # TODO(synk): L not a multiple of 8 (or pad too large for any tile) —
        # fall back to one L tile per batch row; correct but no DMA overlap.
        return l
    return best


# ------------------------------- kernel ---------------------------------------
def _make_kernel(*, tl, k, dil, pad, has_residual, multi_tile):
    """Build the fused CausalBlock kernel for static (tl, k, dil, pad)."""

    def _conv(xp, w_ref, b_ref):
        # xp: (tl + pad, C_in) left-padded rows -> (tl, C_out) f32.
        # Tap-stacked: one MXU dot with contraction depth k*C_in.
        taps = [xp[j * dil: j * dil + tl, :] for j in range(k)]
        xs = taps[0] if k == 1 else jnp.concatenate(taps, axis=-1)
        return jnp.dot(xs, w_ref[...],
                       preferred_element_type=jnp.float32) + b_ref[...]

    def kernel(x_ref, w1_ref, b1_ref, w2_ref, b2_ref, w3_ref, b3_ref, *rest):
        if has_residual:
            wr_ref, br_ref, o_ref, x_c, h1_c, h2_c = rest
        else:
            o_ref, x_c, h1_c, h2_c = rest

        li = pl.program_id(1)

        # Causal left zero-padding: zero the pad-row carries on the first L
        # tile of every batch row (also clears state from the previous row).
        if pad > 0:
            @pl.when(li == 0)
            def _():
                x_c[...] = jnp.zeros_like(x_c)
                h1_c[...] = jnp.zeros_like(h1_c)
                h2_c[...] = jnp.zeros_like(h2_c)

        def _padded(carry_ref, val):
            if pad == 0:
                return val
            return jnp.concatenate([carry_ref[...], val], axis=0)

        x = x_ref[0].astype(jnp.float32)                       # (tl, C_in)

        # conv1 -> ReLU              (dropout == identity in eval mode)
        h1 = jnp.maximum(_conv(_padded(x_c, x), w1_ref, b1_ref), 0.0)
        # conv2 -> ReLU
        h2 = jnp.maximum(_conv(_padded(h1_c, h1), w2_ref, b2_ref), 0.0)
        # conv3, residual folded into the accumulator, then ReLU
        acc = _conv(_padded(h2_c, h2), w3_ref, b3_ref)
        if has_residual:
            acc = acc + (jnp.dot(x, wr_ref[...],
                                 preferred_element_type=jnp.float32)
                         + br_ref[...])
        else:
            acc = acc + x                                      # identity residual

        o_ref[0] = jnp.maximum(acc, 0.0).astype(o_ref.dtype)

        # Carry the last `pad` rows for the next L tile of this batch row.
        if multi_tile and pad > 0:
            x_c[...] = x[tl - pad:, :]
            h1_c[...] = h1[tl - pad:, :]
            h2_c[...] = h2[tl - pad:, :]

    return kernel


# ------------------------------- wrappers --------------------------------------
def causal_block_nlc(x_nlc, params, *, kernel_size, dilation, tile_l=None):
    """Eval-mode CausalBlock on (N, L, C_in) -> (N, L, C_out)."""
    w1, b1, w2, b2, w3, b3, wr, br = params
    n, l, c_in = x_nlc.shape
    c_out = w1.shape[0]
    k = kernel_size
    pad = (k - 1) * dilation
    itemsize = jnp.dtype(x_nlc.dtype).itemsize
    has_residual = wr is not None
    if not has_residual:
        assert c_in == c_out, "identity residual requires C_in == C_out"

    if tile_l is None:
        tile_l = _choose_tile_l(l, pad, c_in, c_out, k, itemsize)
    assert l % tile_l == 0, "tile_l must divide L"
    assert tile_l % 8 == 0 or tile_l == l, "tile_l must be a multiple of 8 (or == L)"
    num_l = l // tile_l
    assert num_l == 1 or tile_l >= pad, "tile_l must cover the causal context"

    # Repack conv weights (O, I, K) -> tap-stacked (K*I, O) so each conv is a
    # single matmul against the channel-stacked taps.
    def stack_w(w):
        o, i, kk = w.shape
        return jnp.transpose(w, (2, 1, 0)).reshape(kk * i, o).astype(jnp.float32)

    inputs = [x_nlc,
              stack_w(w1), b1.reshape(1, c_out).astype(jnp.float32),
              stack_w(w2), b2.reshape(1, c_out).astype(jnp.float32),
              stack_w(w3), b3.reshape(1, c_out).astype(jnp.float32)]

    def full_spec(a):
        shp = a.shape
        return pl.BlockSpec(shp, lambda ni, li: (0,) * len(shp))

    in_specs = [pl.BlockSpec((1, tile_l, c_in), lambda ni, li: (ni, li, 0))]
    in_specs += [full_spec(a) for a in inputs[1:]]

    if has_residual:
        wr_t = jnp.transpose(wr[:, :, 0], (1, 0)).astype(jnp.float32)   # (C_in, C_out)
        br_t = br.reshape(1, c_out).astype(jnp.float32)
        inputs += [wr_t, br_t]
        in_specs += [full_spec(wr_t), full_spec(br_t)]

    out_spec = pl.BlockSpec((1, tile_l, c_out), lambda ni, li: (ni, li, 0))

    carry_rows = max(pad, 1)
    scratch_shapes = [pltpu.VMEM((carry_rows, c_in), jnp.float32),
                      pltpu.VMEM((carry_rows, c_out), jnp.float32),
                      pltpu.VMEM((carry_rows, c_out), jnp.float32)]

    kernel = _make_kernel(tl=tile_l, k=k, dil=dilation, pad=pad,
                          has_residual=has_residual, multi_tile=num_l > 1)

    est = _vmem_estimate(tile_l, pad, c_in, c_out, k, itemsize)
    vmem_limit = int(min(max(2 * est, 32 << 20), 48 << 20))   # safe on v5e/v6e/v7x

    return pl.pallas_call(
        kernel,
        out_shape=jax.ShapeDtypeStruct((n, l, c_out), x_nlc.dtype),
        grid_spec=pltpu.PrefetchScalarGridSpec(
            num_scalar_prefetch=0,
            grid=(n, num_l),
            in_specs=in_specs,
            out_specs=out_spec,
            scratch_shapes=scratch_shapes),
        compiler_params=pltpu.CompilerParams(
            dimension_semantics=("parallel", "arbitrary"),
            vmem_limit_bytes=vmem_limit),
    )(*inputs)


def causal_block(x_ncl, params, *, kernel_size, dilation, tile_l=None):
    """Drop-in for the PyTorch module: (N, C_in, L) -> (N, C_out, L).

    NOTE: for a full TCN stack, call causal_block_nlc directly and transpose
    once at model entry/exit so these NCL<->NLC transposes do not cost an HBM
    round trip per block.
    """
    x_nlc = jnp.transpose(x_ncl, (0, 2, 1))
    out = causal_block_nlc(x_nlc, params, kernel_size=kernel_size,
                           dilation=dilation, tile_l=tile_l)
    return jnp.transpose(out, (0, 2, 1))


# ---------------- pure-JAX reference (NCL, matches the PyTorch module) --------
def _ref_causal_conv(x, w, b, pad, dil):
    y = lax.conv_general_dilated(x, w, window_strides=(1,), padding=[(pad, 0)],
                                 rhs_dilation=(dil,),
                                 dimension_numbers=('NCH', 'OIH', 'NCH'))
    return y + b[None, :, None]


def causal_block_ref(x, params, *, kernel_size, dilation):
    w1, b1, w2, b2, w3, b3, wr, br = params
    pad = (kernel_size - 1) * dilation
    h = jax.nn.relu(_ref_causal_conv(x, w1, b1, pad, dilation))
    h = jax.nn.relu(_ref_causal_conv(h, w2, b2, pad, dilation))
    h = _ref_causal_conv(h, w3, b3, pad, dilation)
    r = _ref_causal_conv(x, wr, br, 0, 1) if wr is not None else x
    return jax.nn.relu(h + r)


if __name__ == "__main__":
    N, C_IN, C_OUT, L, K, DIL = 2, 4, 8, 16, 3, 2

    key = jax.random.PRNGKey(0)
    ks = jax.random.split(key, 12)
    w1 = jax.random.normal(ks[0], (C_OUT, C_IN, K), jnp.float32) * 0.3
    b1 = jax.random.normal(ks[1], (C_OUT,), jnp.float32) * 0.1
    w2 = jax.random.normal(ks[2], (C_OUT, C_OUT, K), jnp.float32) * 0.3
    b2 = jax.random.normal(ks[3], (C_OUT,), jnp.float32) * 0.1
    w3 = jax.random.normal(ks[4], (C_OUT, C_OUT, K), jnp.float32) * 0.3
    b3 = jax.random.normal(ks[5], (C_OUT,), jnp.float32) * 0.1
    wr = jax.random.normal(ks[6], (C_OUT, C_IN, 1), jnp.float32) * 0.3   # 1x1 residual
    br = jax.random.normal(ks[7], (C_OUT,), jnp.float32) * 0.1

    # Case 1: projection residual (C_in != C_out), explicit tile_l=8 so the
    # kernel runs 2 L tiles per batch row and exercises the carried pad-state.
    params1 = (w1, b1, w2, b2, w3, b3, wr, br)
    x1 = jax.random.normal(ks[8], (N, C_IN, L), jnp.float32)
    out1 = jax.block_until_ready(
        causal_block(x1, params1, kernel_size=K, dilation=DIL, tile_l=8))
    ref1 = causal_block_ref(x1, params1, kernel_size=K, dilation=DIL)
    assert out1.shape == (N, C_OUT, L), out1.shape
    assert jnp.allclose(out1, ref1, atol=1e-4, rtol=1e-4), \
        float(jnp.max(jnp.abs(out1 - ref1)))

    # Case 2: identity residual (C_in == C_out, wr is None), auto tile choice.
    w1b = jax.random.normal(ks[9], (C_OUT, C_OUT, K), jnp.float32) * 0.3
    params2 = (w1b, b1, w2, b2, w3, b3, None, None)
    x2 = jax.random.normal(ks[10], (N, C_OUT, L), jnp.float32)
    out2 = jax.block_until_ready(
        causal_block(x2, params2, kernel_size=K, dilation=DIL))
    ref2 = causal_block_ref(x2, params2, kernel_size=K, dilation=DIL)
    assert out2.shape == (N, C_OUT, L), out2.shape
    assert jnp.allclose(out2, ref2, atol=1e-4, rtol=1e-4), \
        float(jnp.max(jnp.abs(out2 - ref2)))

    print("KERNEL_OK")
</pallas_src>

<mosaic_0001>
module attributes {stable_mosaic.version = 11 : i64} {
  func.func @kernel(%arg0: i32, %arg1: i32, %arg2: memref<1x8x4xf32, #tpu.memory_space<vmem>>, %arg3: memref<12x8xf32, #tpu.memory_space<vmem>>, %arg4: memref<1x8xf32, #tpu.memory_space<vmem>>, %arg5: memref<24x8xf32, #tpu.memory_space<vmem>>, %arg6: memref<1x8xf32, #tpu.memory_space<vmem>>, %arg7: memref<24x8xf32, #tpu.memory_space<vmem>>, %arg8: memref<1x8xf32, #tpu.memory_space<vmem>>, %arg9: memref<4x8xf32, #tpu.memory_space<vmem>>, %arg10: memref<1x8xf32, #tpu.memory_space<vmem>>, %arg11: memref<1x8x8xf32, #tpu.memory_space<vmem>>, %arg12: memref<4x4xf32, #tpu.memory_space<vmem>>, %arg13: memref<4x8xf32, #tpu.memory_space<vmem>>, %arg14: memref<4x8xf32, #tpu.memory_space<vmem>>) attributes {dimension_semantics = [#tpu.dimension_semantics<parallel>, #tpu.dimension_semantics<arbitrary>], iteration_bounds = array<i64: 2, 2>, scalar_prefetch = 0 : i64, scratch_operands = 3 : i64, tpu.core_type = #tpu.core_type<tc>, window_params = [{transform_indices = @transform_0, window_bounds = array<i64: 1, 8, 4>}, {pipeline_mode = #tpu.pipeline_mode<synchronous>, transform_indices = @transform_1, window_bounds = array<i64: 12, 8>}, {pipeline_mode = #tpu.pipeline_mode<synchronous>, transform_indices = @transform_2, window_bounds = array<i64: 1, 8>}, {pipeline_mode = #tpu.pipeline_mode<synchronous>, transform_indices = @transform_3, window_bounds = array<i64: 24, 8>}, {pipeline_mode = #tpu.pipeline_mode<synchronous>, transform_indices = @transform_4, window_bounds = array<i64: 1, 8>}, {pipeline_mode = #tpu.pipeline_mode<synchronous>, transform_indices = @transform_5, window_bounds = array<i64: 24, 8>}, {pipeline_mode = #tpu.pipeline_mode<synchronous>, transform_indices = @transform_6, window_bounds = array<i64: 1, 8>}, {pipeline_mode = #tpu.pipeline_mode<synchronous>, transform_indices = @transform_7, window_bounds = array<i64: 4, 8>}, {pipeline_mode = #tpu.pipeline_mode<synchronous>, transform_indices = @transform_8, window_bounds = array<i64: 1, 8>}, {transform_indices = @transform_9, window_bounds = array<i64: 1, 8, 8>}]} {
    %c0_i32 = arith.constant 0 : i32
    %0 = arith.cmpi eq, %arg1, %c0_i32 : i32
    %1 = arith.extui %0 : i1 to i32
    %c0_i32_0 = arith.constant 0 : i32
    %2 = arith.cmpi ne, %1, %c0_i32_0 : i32
    scf.if %2 {
      %cst_40 = arith.constant 0.000000e+00 : f32
      %59 = vector.broadcast %cst_40 : f32 to vector<4x4xf32>
      %c0_41 = arith.constant 0 : index
      %c0_42 = arith.constant 0 : index
      %60 = vector.load %arg12[%c0_41, %c0_42] : memref<4x4xf32, #tpu.memory_space<vmem>>, vector<4x4xf32>
      tpu.vector_store %arg12[%c0_41, %c0_42], %59 {strides = array<i32>} : memref<4x4xf32, #tpu.memory_space<vmem>>, vector<4x4xf32>,
      %cst_43 = arith.constant 0.000000e+00 : f32
      %61 = vector.broadcast %cst_43 : f32 to vector<4x8xf32>
      %c0_44 = arith.constant 0 : index
      %c0_45 = arith.constant 0 : index
      %62 = vector.load %arg13[%c0_44, %c0_45] : memref<4x8xf32, #tpu.memory_space<vmem>>, vector<4x8xf32>
      tpu.vector_store %arg13[%c0_44, %c0_45], %61 {strides = array<i32>} : memref<4x8xf32, #tpu.memory_space<vmem>>, vector<4x8xf32>,
      %cst_46 = arith.constant 0.000000e+00 : f32
      %63 = vector.broadcast %cst_46 : f32 to vector<4x8xf32>
      %c0_47 = arith.constant 0 : index
      %c0_48 = arith.constant 0 : index
      %64 = vector.load %arg14[%c0_47, %c0_48] : memref<4x8xf32, #tpu.memory_space<vmem>>, vector<4x8xf32>
      tpu.vector_store %arg14[%c0_47, %c0_48], %63 {strides = array<i32>} : memref<4x8xf32, #tpu.memory_space<vmem>>, vector<4x8xf32>,
    } else {
    }
    %c0 = arith.constant 0 : index
    %c0_1 = arith.constant 0 : index
    %c0_2 = arith.constant 0 : index
    %3 = vector.load %arg2[%c0, %c0_1, %c0_2] : memref<1x8x4xf32, #tpu.memory_space<vmem>>, vector<1x8x4xf32>
    %4 = vector.shape_cast %3 : vector<1x8x4xf32> to vector<8x4xf32>
    %c0_3 = arith.constant 0 : index
    %c0_4 = arith.constant 0 : index
    %5 = vector.load %arg12[%c0_3, %c0_4] : memref<4x4xf32, #tpu.memory_space<vmem>>, vector<4x4xf32>
    %6 = tpu.concatenate %5, %4 in 0 : vector<4x4xf32>, vector<8x4xf32> -> vector<12x4xf32>
    %7 = vector.extract_strided_slice %6 {offsets = [0, 0], sizes = [8, 4], strides = [1, 1]} : vector<12x4xf32> to vector<8x4xf32>
    %8 = vector.extract_strided_slice %6 {offsets = [2, 0], sizes = [8, 4], strides = [1, 1]} : vector<12x4xf32> to vector<8x4xf32>
    %9 = vector.extract_strided_slice %6 {offsets = [4, 0], sizes = [8, 4], strides = [1, 1]} : vector<12x4xf32> to vector<8x4xf32>
    %10 = tpu.concatenate %7, %8, %9 in 1 : vector<8x4xf32>, vector<8x4xf32>, vector<8x4xf32> -> vector<8x12xf32>
    %c0_5 = arith.constant 0 : index
    %c0_6 = arith.constant 0 : index
    %11 = vector.load %arg3[%c0_5, %c0_6] : memref<12x8xf32, #tpu.memory_space<vmem>>, vector<12x8xf32>
    %cst = arith.constant dense<0.000000e+00> : vector<8x8xf32>
    %12 = tpu.matmul %10, %11, %cst {dimension_numbers = #tpu.dot_dimension_numbers<[1], [0], [0], [1], [0, 0, 1, 1], [], []>} : vector<8x12xf32>, vector<12x8xf32>, vector<8x8xf32> -> vector<8x8xf32>
    %c0_7 = arith.constant 0 : index
    %c0_8 = arith.constant 0 : index
    %13 = vector.load %arg4[%c0_7, %c0_8] : memref<1x8xf32, #tpu.memory_space<vmem>>, vector<1x8xf32>
    %14 = vector.broadcast %13 : vector<1x8xf32> to vector<8x8xf32>
    %15 = arith.addf %12, %14 : vector<8x8xf32>
    %cst_9 = arith.constant 0.000000e+00 : f32
    %16 = vector.broadcast %cst_9 : f32 to vector<8x8xf32>
    %17 = arith.maximumf %15, %16 : vector<8x8xf32>
    %c0_10 = arith.constant 0 : index
    %c0_11 = arith.constant 0 : index
    %18 = vector.load %arg13[%c0_10, %c0_11] : memref<4x8xf32, #tpu.memory_space<vmem>>, vector<4x8xf32>
    %19 = tpu.concatenate %18, %17 in 0 : vector<4x8xf32>, vector<8x8xf32> -> vector<12x8xf32>
    %20 = vector.extract_strided_slice %19 {offsets = [0, 0], sizes = [8, 8], strides = [1, 1]} : vector<12x8xf32> to vector<8x8xf32>
    %21 = vector.extract_strided_slice %19 {offsets = [2, 0], sizes = [8, 8], strides = [1, 1]} : vector<12x8xf32> to vector<8x8xf32>
    %22 = vector.extract_strided_slice %19 {offsets = [4, 0], sizes = [8, 8], strides = [1, 1]} : vector<12x8xf32> to vector<8x8xf32>
    %23 = tpu.concatenate %20, %21, %22 in 1 : vector<8x8xf32>, vector<8x8xf32>, vector<8x8xf32> -> vector<8x24xf32>
    %c0_12 = arith.constant 0 : index
    %c0_13 = arith.constant 0 : index
    %24 = vector.load %arg5[%c0_12, %c0_13] : memref<24x8xf32, #tpu.memory_space<vmem>>, vector<24x8xf32>
    %cst_14 = arith.constant dense<0.000000e+00> : vector<8x8xf32>
    %25 = tpu.matmul %23, %24, %cst_14 {dimension_numbers = #tpu.dot_dimension_numbers<[1], [0], [0], [1], [0, 0, 1, 1], [], []>} : vector<8x24xf32>, vector<24x8xf32>, vector<8x8xf32> -> vector<8x8xf32>
    %c0_15 = arith.constant 0 : index
    %c0_16 = arith.constant 0 : index
    %26 = vector.load %arg6[%c0_15, %c0_16] : memref<1x8xf32, #tpu.memory_space<vmem>>, vector<1x8xf32>
    %27 = vector.broadcast %26 : vector<1x8xf32> to vector<8x8xf32>
    %28 = arith.addf %25, %27 : vector<8x8xf32>
    %cst_17 = arith.constant 0.000000e+00 : f32
    %29 = vector.broadcast %cst_17 : f32 to vector<8x8xf32>
    %30 = arith.maximumf %28, %29 : vector<8x8xf32>
    %c0_18 = arith.constant 0 : index
    %c0_19 = arith.constant 0 : index
    %31 = vector.load %arg14[%c0_18, %c0_19] : memref<4x8xf32, #tpu.memory_space<vmem>>, vector<4x8xf32>
    %32 = tpu.concatenate %31, %30 in 0 : vector<4x8xf32>, vector<8x8xf32> -> vector<12x8xf32>
    %33 = vector.extract_strided_slice %32 {offsets = [0, 0], sizes = [8, 8], strides = [1, 1]} : vector<12x8xf32> to vector<8x8xf32>
    %34 = vector.extract_strided_slice %32 {offsets = [2, 0], sizes = [8, 8], strides = [1, 1]} : vector<12x8xf32> to vector<8x8xf32>
    %35 = vector.extract_strided_slice %32 {offsets = [4, 0], sizes = [8, 8], strides = [1, 1]} : vector<12x8xf32> to vector<8x8xf32>
    %36 = tpu.concatenate %33, %34, %35 in 1 : vector<8x8xf32>, vector<8x8xf32>, vector<8x8xf32> -> vector<8x24xf32>
    %c0_20 = arith.constant 0 : index
    %c0_21 = arith.constant 0 : index
    %37 = vector.load %arg7[%c0_20, %c0_21] : memref<24x8xf32, #tpu.memory_space<vmem>>, vector<24x8xf32>
    %cst_22 = arith.constant dense<0.000000e+00> : vector<8x8xf32>
    %38 = tpu.matmul %36, %37, %cst_22 {dimension_numbers = #tpu.dot_dimension_numbers<[1], [0], [0], [1], [0, 0, 1, 1], [], []>} : vector<8x24xf32>, vector<24x8xf32>, vector<8x8xf32> -> vector<8x8xf32>
    %c0_23 = arith.constant 0 : index
    %c0_24 = arith.constant 0 : index
    %39 = vector.load %arg8[%c0_23, %c0_24] : memref<1x8xf32, #tpu.memory_space<vmem>>, vector<1x8xf32>
    %40 = vector.broadcast %39 : vector<1x8xf32> to vector<8x8xf32>
    %41 = arith.addf %38, %40 : vector<8x8xf32>
    %c0_25 = arith.constant 0 : index
    %c0_26 = arith.constant 0 : index
    %42 = vector.load %arg9[%c0_25, %c0_26] : memref<4x8xf32, #tpu.memory_space<vmem>>, vector<4x8xf32>
    %cst_27 = arith.constant dense<0.000000e+00> : vector<8x8xf32>
    %43 = tpu.matmul %4, %42, %cst_27 {dimension_numbers = #tpu.dot_dimension_numbers<[1], [0], [0], [1], [0, 0, 1, 1], [], []>} : vector<8x4xf32>, vector<4x8xf32>, vector<8x8xf32> -> vector<8x8xf32>
    %c0_28 = arith.constant 0 : index
    %c0_29 = arith.constant 0 : index
    %44 = vector.load %arg10[%c0_28, %c0_29] : memref<1x8xf32, #tpu.memory_space<vmem>>, vector<1x8xf32>
    %45 = vector.broadcast %44 : vector<1x8xf32> to vector<8x8xf32>
    %46 = arith.addf %43, %45 : vector<8x8xf32>
    %47 = arith.addf %41, %46 : vector<8x8xf32>
    %cst_30 = arith.constant 0.000000e+00 : f32
    %48 = vector.broadcast %cst_30 : f32 to vector<8x8xf32>
    %49 = arith.maximumf %47, %48 : vector<8x8xf32>
    %c0_31 = arith.constant 0 : index
    %c0_32 = arith.constant 0 : index
    %c0_33 = arith.constant 0 : index
    %50 = vector.load %arg11[%c0_31, %c0_32, %c0_33] : memref<1x8x8xf32, #tpu.memory_space<vmem>>, vector<1x8x8xf32>
    %51 = vector.shape_cast %50 : vector<1x8x8xf32> to vector<8x8xf32>
    %52 = vector.shape_cast %49 : vector<8x8xf32> to vector<1x8x8xf32>
    tpu.vector_store %arg11[%c0_31, %c0_32, %c0_33], %52 {strides = array<i32>} : memref<1x8x8xf32, #tpu.memory_space<vmem>>, vector<1x8x8xf32>,
    %53 = vector.extract_strided_slice %4 {offsets = [4, 0], sizes = [4, 4], strides = [1, 1]} : vector<8x4xf32> to vector<4x4xf32>
    %c0_34 = arith.constant 0 : index
    %c0_35 = arith.constant 0 : index
    %54 = vector.load %arg12[%c0_34, %c0_35] : memref<4x4xf32, #tpu.memory_space<vmem>>, vector<4x4xf32>
    tpu.vector_store %arg12[%c0_34, %c0_35], %53 {strides = array<i32>} : memref<4x4xf32, #tpu.memory_space<vmem>>, vector<4x4xf32>,
    %55 = vector.extract_strided_slice %17 {offsets = [4, 0], sizes = [4, 8], strides = [1, 1]} : vector<8x8xf32> to vector<4x8xf32>
    %c0_36 = arith.constant 0 : index
    %c0_37 = arith.constant 0 : index
    %56 = vector.load %arg13[%c0_36, %c0_37] : memref<4x8xf32, #tpu.memory_space<vmem>>, vector<4x8xf32>
    tpu.vector_store %arg13[%c0_36, %c0_37], %55 {strides = array<i32>} : memref<4x8xf32, #tpu.memory_space<vmem>>, vector<4x8xf32>,
    %57 = vector.extract_strided_slice %30 {offsets = [4, 0], sizes = [4, 8], strides = [1, 1]} : vector<8x8xf32> to vector<4x8xf32>
    %c0_38 = arith.constant 0 : index
    %c0_39 = arith.constant 0 : index
    %58 = vector.load %arg14[%c0_38, %c0_39] : memref<4x8xf32, #tpu.memory_space<vmem>>, vector<4x8xf32>
    tpu.vector_store %arg14[%c0_38, %c0_39], %57 {strides = array<i32>} : memref<4x8xf32, #tpu.memory_space<vmem>>, vector<4x8xf32>,
    return
  }
  func.func @transform_0(%arg0: i32, %arg1: i32) -> (i32, i32, i32) {
    %c0_i32 = arith.constant 0 : i32
    %c0_i32_0 = arith.constant 0 : i32
    return %arg0, %arg1, %c0_i32 : i32, i32, i32
  }
  func.func @transform_1(%arg0: i32, %arg1: i32) -> (i32, i32) {
    %c0_i32 = arith.constant 0 : i32
    %c0_i32_0 = arith.constant 0 : i32
    %c0_i32_1 = arith.constant 0 : i32
    return %c0_i32, %c0_i32_0 : i32, i32
  }
  func.func @transform_2(%arg0: i32, %arg1: i32) -> (i32, i32) {
    %c0_i32 = arith.constant 0 : i32
    %c0_i32_0 = arith.constant 0 : i32
    %c0_i32_1 = arith.constant 0 : i32
    return %c0_i32, %c0_i32_0 : i32, i32
  }
  func.func @transform_3(%arg0: i32, %arg1: i32) -> (i32, i32) {
    %c0_i32 = arith.constant 0 : i32
    %c0_i32_0 = arith.constant 0 : i32
    %c0_i32_1 = arith.constant 0 : i32
    return %c0_i32, %c0_i32_0 : i32, i32
  }
  func.func @transform_4(%arg0: i32, %arg1: i32) -> (i32, i32) {
    %c0_i32 = arith.constant 0 : i32
    %c0_i32_0 = arith.constant 0 : i32
    %c0_i32_1 = arith.constant 0 : i32
    return %c0_i32, %c0_i32_0 : i32, i32
  }
  func.func @transform_5(%arg0: i32, %arg1: i32) -> (i32, i32) {
    %c0_i32 = arith.constant 0 : i32
    %c0_i32_0 = arith.constant 0 : i32
    %c0_i32_1 = arith.constant 0 : i32
    return %c0_i32, %c0_i32_0 : i32, i32
  }
  func.func @transform_6(%arg0: i32, %arg1: i32) -> (i32, i32) {
    %c0_i32 = arith.constant 0 : i32
    %c0_i32_0 = arith.constant 0 : i32
    %c0_i32_1 = arith.constant 0 : i32
    return %c0_i32, %c0_i32_0 : i32, i32
  }
  func.func @transform_7(%arg0: i32, %arg1: i32) -> (i32, i32) {
    %c0_i32 = arith.constant 0 : i32
    %c0_i32_0 = arith.constant 0 : i32
    %c0_i32_1 = arith.constant 0 : i32
    return %c0_i32, %c0_i32_0 : i32, i32
  }
  func.func @transform_8(%arg0: i32, %arg1: i32) -> (i32, i32) {
    %c0_i32 = arith.constant 0 : i32
    %c0_i32_0 = arith.constant 0 : i32
    %c0_i32_1 = arith.constant 0 : i32
    return %c0_i32, %c0_i32_0 : i32, i32
  }
  func.func @transform_9(%arg0: i32, %arg1: i32) -> (i32, i32, i32) {
    %c0_i32 = arith.constant 0 : i32
    %c0_i32_0 = arith.constant 0 : i32
    return %arg0, %arg1, %c0_i32 : i32, i32, i32
  }
}

</mosaic_0001>

<bundles_post_ra>
// kernel: tpu_custom_call.1
= control target key start
LH: loop header
LB: loop body
LE: loop exit
PB: predicated region body
PF: predicated region fallthrough
CT: control target
= control target key end

     0   :  { %s1096_s30 = smov 0   ;;  %s1098_s10 = smov 0   ;;  %s1233_s0 = inlined_call_operand.vmem [shape: f32[2,16,4], index: 0, kind: input, shape index: {}]   ;;  %s1234_s1 = inlined_call_operand.vmem [shape: f32[12,8], index: 1, kind: input, shape index: {}]   ;;  %s1235_s2 = inlined_call_operand.vmem [shape: f32[1,8], index: 2, kind: input, shape index: {}]   ;;  %s1236_s3 = inlined_call_operand.vmem [shape: f32[24,8], index: 3, kind: input, shape index: {}]   ;;  %s1237_s4 = inlined_call_operand.vmem [shape: f32[1,8], index: 4, kind: input, shape index: {}]   ;;  %s1238_s5 = inlined_call_operand.vmem [shape: f32[24,8], index: 5, kind: input, shape index: {}]   ;;  %s1239_s6 = inlined_call_operand.vmem [shape: f32[1,8], index: 6, kind: input, shape index: {}]   ;;  %s1240_s7 = inlined_call_operand.vmem [shape: f32[4,8], index: 7, kind: input, shape index: {}]   ;;  %s1241_s8 = inlined_call_operand.vmem [shape: f32[1,8], index: 8, kind: input, shape index: {}]   ;;  %s1242_s9 = inlined_call_operand.vmem [shape: f32[2,16,8], index: 9, kind: output, shape index: {}]  }
   0x1   :  { %s1100_s11 = smov 0   ;;  %s1102_s12 = smov 0  }
   0x2   :  { %s1104_s13 = smov 0  }
   0x3 LB: > { %s28_s14 = sadd.s32 1, %s1028_s11  ;;  %s31_s15 = sadd.s32 1, %s1032_s12  ;;  %s1036_s13 = sphi %s1104_s13, %s19_s13   ;;  %s1032_s12 = sphi %s1102_s12, %s1246_s12   ;;  %s1028_s11 = sphi %s1100_s11, %s1245_s11   ;;  %s1024_s10 = sphi %s1098_s10, %s1244_s10   ;;  %s1020_s30 = sphi %s1096_s30, %s1243_s30  }
   0x4   : > { %p29_p0 = scmp.ge.s32.totalorder %s28_s14, 2  ;;  %p875_p1 = scmp.ge.s32.totalorder %s1036_s13, 1 }
   0x5   : > { %p306_p2 = scmp.lt.s32.totalorder %s1036_s13, 5 }
   0x6   : > { %s1248_s14 = smov (%p29_p0, %s28_s14), 0  ;;  %s1250_s15 = smov (!%p29_p0, %s31_s15), %s1032_s12 }
   0x7   : > { %p307_p3 = pnand %p875_p1, %p306_p2  ;;  %p33_p4 = scmp.ge.s32.totalorder %s1250_s15, 2 }
   0x8   : > { %p348_p5 = scmp.lt.s32.totalorder (!%p307_p3), %s1024_s10, 1  ;;  %p350_p6 = scmp.lt.s32.totalorder (!%p307_p3), %s1020_s30, 1 }
   0x9   : > { %s1252_s15 = smov (%p33_p4, %s1250_s15), 0  ;;  %310 = sbr.rel (%p307_p3) target bundleno = 1057 (0x421), region = 56 }
   0xa   : > { %p880_p7 = scmp.ne.s32.totalorder (!%p307_p3), %s1020_s30, 0 }
  0x10   : > { %s1254_s10 = smov (!%p348_p5, %s1024_s10), 1  ;;  %367 = sbr.rel (%p880_p7) target bundleno = 23 (0x17), region = 60 }
  0x11   : > { %s351_s16 = scalar_select %p350_p6, %s1020_s30, 1 }
  0x12   : > { %s876_s17 = sshll.u32 %s1254_s10, 1  ;;  %vm368_vm0 = vcmask (!%p880_p7), 27648   ;;  %vm370_vm1 = vcmask (!%p880_p7), 60416   ;;  %v1038_v0 = vmov (!%p880_p7), 0.0  }
  0x13   : > { %s353_s18 = sadd.s32 %s876_s17, %s351_s16  ;;  %369 = vst.msk [vmem:[#allocation2] sm:$0xf] (!%p880_p7), %vm368_vm0, %v1038_v0 }
  0x14   : > { %s877_s19 = sshll.u32 %s353_s18, 3  ;;  %371 = vst.msk [vmem:[#allocation3] sm:$0xf] (!%p880_p7), %vm370_vm1, %v1038_v0  ;;  %372 = vst.msk [vmem:[#allocation4] sm:$0xf] (!%p880_p7), %vm370_vm1, %v1038_v0 }
  0x15   : > { %s355_s22 = scalar_lea.vmem %s1233_s0, %s877_s19  ;;  %s1132_s25 = scalar_lea.vmem %s1242_s9, %s877_s19 }
  0x17 PF: > { %v1134_v1 = vld [vmem:[%s355_s22] sm:$0xff]  ;;  %vm378_vm2 = vcmask 1043456   ;;  %vm780_vm3 = vcmask 31748   ;;  %v1039_v5 = vmov 0.0|0.0   ;;  %v399_v6 = vld [vmem:[%s1234_s1 + $0x8] sm:$0xf] }
  0x18   : > { %v376_v3 = vrot.slane %v1134_v1, 4  ;;  %v398_v4 = vld [vmem:[%s1234_s1] sm:$0xff]  ;;  %936 = vmatprep.subr.bf16.mxu1 %v1039_v5  ;;  %943 = vmatprep.subr.bf16.mxu0 %v1039_v5  ;;  %vm381_vm4 = vcmask 1045504   ;;  %vm1040_vm5 = vmmov 1   ;;  %vm1041_vm7 = vmmov 0   ;;  %s1043_s30 = smov 4  }
  0x19   : > { %v937_v9 = vpack.c.bf16 %v399_v6, %v398_v4  ;;  %vm938_vm6 = vmpackc.low %vm378_vm2, %vm1040_vm5  ;;  %v1042_v10 = vmov 0.0   ;;  %s1044_s10 = smov 8   ;;  %vm394_vm8 = vcmask 31744   ;;  %vm396_vm9 = vcmask 64512   ;;  %v506_v20 = vld [vmem:[%s1236_s3] sm:$0xff]  ;;  %v507_v21 = vld [vmem:[%s1236_s3 + $0x8] sm:$0xff] }
  0x1a   : > { %v374_v2 = vld [vmem:[#allocation2] sm:$0xf]  ;;  %v383_v8 = vrot.slane %v376_v3, 2  ;;  %910 = vmatprep.mubr.msk.f32.mxu1 %vm1041_vm7, %v1042_v10  ;;  %928 = vmatprep.mubr.msk.f32.mxu0 %vm1041_vm7, %v1042_v10  ;;  %v389_v13 = vrot.slane %v376_v3, 4  ;;  %vm407_vm10 = vcmask 97280   ;;  %v941_v22 = vpack.c.bf16 %v507_v21, %v506_v20  ;;  %v508_v24 = vld [vmem:[%s1236_s3 + $0x10] sm:$0xff] }
  0x1b   : > { %781 = vst.msk [vmem:[#allocation2 - $0x4] sm:$0xf0] %vm780_vm3, %v1134_v1  ;;  %v379_v7 = vsel %vm378_vm2, %v374_v2, %v376_v3  ;;  %939 = vmatpush3.bf16.msk.msra.mxu1 %vm938_vm6, %v937_v9  ;;  %v881_v23 = vld [vmem:[%s1235_s2] ss:$0 sm:$0xff]  ;;  %v485_v28 = vld [vmem:[#allocation3] sm:$0xf] }
  0x1c   : > { %v382_v11 = vrot.slane %v379_v7, 2  ;;  %v388_v12 = vrot.slane %v379_v7, 4  ;;  %940 = vmatprep.subr.bf16.mxu1 %v1039_v5  ;;  %vm782_vm11 = vcmask 64516   ;;  %s1045_s24 = smov 16   ;;  %vm504_vm12 = vcmask 130048   ;;  %v611_v42 = vld [vmem:[%s1238_s5] sm:$0xff] }
  0x1d   : > { %vm516_vm13 = vcmask 195584   ;;  %v612_v43 = vld [vmem:[%s1238_s5 + $0x8] sm:$0xff]  ;;  %v884_v45 = vld [vmem:[%s1237_s4] ss:$0 sm:$0xff]  ;;  %v613_v46 = vld [vmem:[%s1238_s5 + $0x10] sm:$0xff] }
  0x1e   : > { %v384_v14 = vsel %vm381_vm4, %v382_v11, %v383_v8  ;;  %v390_v15 = vsel %vm378_vm2, %v388_v12, %v389_v13  ;;  %v944_v44 = vpack.c.bf16 %v612_v43, %v611_v42  ;;  %v591_v50 = vld [vmem:[#allocation4] sm:$0xf]  ;;  %v694_v63 = vld [vmem:[%s1240_s7] sm:$0xf] }
  0x1f   : > { %385 = vrot.lane.b32.xlu0 %v384_v14, %s1043_s30  ;;  %v886_v2 = vld [vmem:[%s1239_s6] ss:$0 sm:$0xff] }
  0x20   : > { %945 = vmatpush3.bf16.msra.mxu0 %v944_v44  ;;  %v888_v3 = vld [vmem:[%s1241_s8] ss:$0 sm:$0xff] }
  0x21   : > { %926 = vmatprep.subr.mxu0 %v1042_v10  ;;  %v946_v4 = vadd.f32 %v888_v3, %v886_v2 }
  0x23   : > { %391 = vrot.lane.b32.xlu0 %v390_v15, %s1044_s10 }
  0x24   : > { %927 = vmatpush3.msra.mxu0 %v613_v46 }
  0x25   : > { %931 = vmatprep.subr.mxu0 %v1042_v10 }
  0x91   : > { %v386_v16 = vpop.permute.xlu0 %385 }
  0x92   : > { %v395_v17 = vsel %vm394_vm8, %v379_v7, %v386_v16 }
  0x95   : > { %v392_v18 = vpop.permute.xlu0 %391 }
  0x96   : > { %v397_v19 = vsel %vm396_vm9, %v395_v17, %v392_v18 }
  0x97   : > { %911 = vmatmul.mubr.msk.f32.vlgmr.msra.gmra.mrb[0].mxu1 %vm407_vm10, %v397_v19 }
  0x98   : > { %919 = vmatprep.mubr.msk.f32.mxu1 %vm1041_vm7, %v1042_v10  ;;  %942 = vmatpush3.bf16.msra.mxu1 %v941_v22 }
  0x99   : > { %917 = vmatprep.subr.mxu1 %v1042_v10 }
  0x9c   : > { %918 = vmatpush3.msra.mxu1 %v508_v24 }
 0x16a   : > { %v480_v25 = vpop.f32.mrb[0].mxu1 }
 0x16b   : > { %v481_v26 = vadd.f32 %v881_v23, %v480_v25  ;;  %v912_v27 = vpop.f32.mrb[1].mxu1 }
 0x16d   : > { %v484_v29 = vmax.f32 %v481_v26, 0.0 }
 0x16f   : > { %v487_v30 = vrot.slane %v484_v29, 4  ;;  %783 = vst.msk [vmem:[#allocation3 - $0x4] sm:$0xf0] %vm782_vm11, %v484_v29 }
 0x171   : > { %v489_v31 = vsel %vm378_vm2, %v485_v28, %v487_v30  ;;  %v492_v32 = vrot.slane %v487_v30, 2  ;;  %v498_v36 = vrot.slane %v487_v30, 4 }
 0x172   : > { %v491_v33 = vrot.slane %v489_v31, 2  ;;  %v497_v35 = vrot.slane %v489_v31, 4 }
 0x174   : > { %v493_v34 = vsel %vm381_vm4, %v491_v33, %v492_v32  ;;  %v499_v37 = vsel %vm378_vm2, %v497_v35, %v498_v36 }
 0x175   : > { %494 = vrot.lane.b32.xlu1 %v493_v34, %s1044_s10 }
 0x179   : > { %500 = vrot.lane.b32.xlu1 %v499_v37, %s1045_s24 }
 0x1e7   : > { %v495_v38 = vpop.permute.xlu1 %494 }
 0x1e8   : > { %v503_v39 = vsel %vm396_vm9, %v489_v31, %v495_v38 }
 0x1eb   : > { %v501_v40 = vpop.permute.xlu1 %500 }
 0x1ec   : > { %v505_v41 = vsel %vm504_vm12, %v503_v39, %v501_v40 }
 0x1ed   : > { %920 = vmatmul.mubr.msk.f32.vlgmr.msra.gmra.mrb[2].mxu1 %vm516_vm13, %v505_v41 }
 0x2c0   : > { %v586_v47 = vpop.f32.mrb[2].mxu1 }
 0x2c1   : > { %v587_v48 = vadd.f32 %v884_v45, %v586_v47  ;;  %v921_v49 = vpop.f32.mrb[3].mxu1 }
 0x2c3   : > { %v590_v51 = vmax.f32 %v587_v48, 0.0 }
 0x2c5   : > { %v593_v52 = vrot.slane %v590_v51, 4  ;;  %784 = vst.msk [vmem:[#allocation4 - $0x4] sm:$0xf0] %vm782_vm11, %v590_v51 }
 0x2c7   : > { %v595_v53 = vsel %vm378_vm2, %v591_v50, %v593_v52  ;;  %v604_v54 = vrot.slane %v593_v52, 4  ;;  %v598_v55 = vrot.slane %v593_v52, 2 }
 0x2c8   : > { %v603_v56 = vrot.slane %v595_v53, 4  ;;  %v597_v57 = vrot.slane %v595_v53, 2 }
 0x2ca   : > { %v605_v58 = vsel %vm378_vm2, %v603_v56, %v604_v54  ;;  %v599_v59 = vsel %vm381_vm4, %v597_v57, %v598_v55 }
 0x2cb   : > { %606 = vrot.lane.b32.xlu1 %v605_v58, %s1045_s24  ;;  %600 = vrot.lane.b32.xlu0 %v599_v59, %s1044_s10 }
 0x33d   : > { %v607_v60 = vpop.permute.xlu1 %606  ;;  %v601_v61 = vpop.permute.xlu0 %600 }
 0x33e   : > { %v609_v62 = vsel %vm396_vm9, %v595_v53, %v601_v61 }
 0x33f   : > { %v610_v0 = vsel %vm504_vm12, %v609_v62, %v607_v60 }
 0x340   : > { %929 = vmatmul.mubr.msk.f32.vlgmr.msra.gmra.mrb[0].mxu0 %vm516_vm13, %v610_v0 }
 0x341   : > { %932 = vmatpush3.msk.msra.mxu0 %vm378_vm2, %v694_v63  ;;  %933 = vmatprep.mubr.msk.f32.mxu0 %vm1041_vm7, %v1042_v10 }
 0x348   : > { %934 = vmatmul.mubr.msk.f32.vlgmr.msra.gmra.mrb[0].mxu0 %vm394_vm8, %v1134_v1 }
 0x41b   : > { %v773_v5 = vpop.f32.mrb[0].mxu0 }
 0x41c   : > { %v947_v6 = vadd.f32 %v946_v4, %v773_v5  ;;  %v935_v7 = vpop.f32.mrb[1].mxu0 }
 0x41e   : > { %v778_v8 = vmax.f32 %v947_v6, 0.0 }
 0x420   : > { %779 = vst.msk [vmem:[%s1132_s25] sm:$0xff] %vm396_vm9, %v778_v8 }
 0x421 PF: > { %s19_s13 = sadd.s32 1, %s1036_s13   ;;  %s1243_s30 = smov %s1028_s11 }
 0x422   : > { %p16_p8 = scmp.ge.s32.totalorder %s19_s13, 6   ;;  %s1244_s10 = smov %s1032_s12 }
 0x423   : > { %s1245_s11 = smov %s1248_s14  ;;  %s1246_s12 = smov %s1252_s15 }
 0x424   :  { %18 = sbr.rel (!%p16_p8) target bundleno = 3 (0x3), region = 90 }

</bundles_post_ra>
